<compile_context>
chip_gen: v6e
topology: v6e:2x2x1
jax: 0.10.0
libtpu: 0.0.40
codegen_flags: <defaults>
</compile_context>

<pallas_src>
import jax
import jax.numpy as jnp
from jax.experimental import pallas as pl
from jax.experimental.pallas import tpu as pltpu


def _self_attn_kernel(x_ref, w1_ref, b1_ref, w2_ref, out_ref, wts_ref):
    # x_ref:  (TB, T, H) batch tile (f32 or bf16)
    # w1_ref: (H, P), b1_ref: (1, P), w2_ref: (1, P) row
    # out_ref: (TB, H), wts_ref: (TB, T)  (lane-dense weights)
    tb, T, H = x_ref.shape
    P = w1_ref.shape[1]

    x = x_ref[...]                                                  # (TB, T, H)

    # Projection Linear(H, P) -> ReLU as one (TB*T, H) @ (H, P) MXU matmul, f32 accumulate.
    # NOTE: the flatten is free only when T % 8 == 0 (sublane-aligned merge). For ragged
    # production T, pad T to a multiple of 8 in the wrapper (with energy masking) instead,
    # to avoid a VMEM relayout here.
    x2 = x.reshape(tb * T, H)
    h = jnp.dot(x2, w1_ref[...], preferred_element_type=jnp.float32) + b1_ref[...]
    h = jnp.maximum(h, 0.0)                                         # (TB*T, P) f32

    # Linear(P, 1) as VPU multiply + lane reduce against the (1, P) w2 row (avoids an
    # N=1 MXU matmul). b2 is intentionally dropped: softmax(e + b2) == softmax(e).
    e = jnp.sum((h * w2_ref[...]).reshape(tb, T, P), axis=-1)       # (TB, T) f32

    # Row-wise softmax over the time axis, f32 throughout (also for bf16 inputs).
    m = jnp.max(e, axis=-1, keepdims=True)                          # (TB, 1)
    p = jnp.exp(e - m)                                              # (TB, T)
    s = jnp.sum(p, axis=-1, keepdims=True)                          # (TB, 1)
    # exact reciprocal keeps the 1e-5 tolerance; approx=True (EUP vrcp) + 1 Newton step
    # is a free further win if a looser tolerance is acceptable.
    w = p * pl.reciprocal(s, approx=False)                          # (TB, T) f32

    # Weighted sum over time; product/accumulation promote to f32 because w is f32.
    # TODO(synk): on v7x with bf16 inputs, if the VALU slot binds, offload this to the MXU
    # via jnp.einsum('bt,bth->bh', w.astype(x.dtype), x, preferred_element_type=f32).
    out = jnp.sum(x * w[..., None], axis=1)                         # (TB, H) f32

    out_ref[...] = out.astype(out_ref.dtype)
    wts_ref[...] = w.astype(wts_ref.dtype)


def _tpu_budgets():
    """Generation-aware (min grid steps, per-block byte budget, scoped VMEM limit)."""
    kind = ""
    try:
        kind = jax.devices()[0].device_kind.lower()
    except Exception:
        pass
    if "v7" in kind:
        # 2 TensorCores/chip, 64 MiB physical VMEM: keep >= 2 grid steps, modest blocks.
        return {"min_steps": 2, "max_block_bytes": 4 << 20, "vmem_limit": 32 << 20}
    if "v6" in kind:
        # single TC, 128 MiB physical VMEM: prefer one big tile, raise the scoped limit.
        return {"min_steps": 1, "max_block_bytes": 14 << 20, "vmem_limit": 64 << 20}
    # v5e / unknown: single TC, 128 MiB physical (16 MiB default scoped limit).
    return {"min_steps": 1, "max_block_bytes": 7 << 20, "vmem_limit": 64 << 20}


def _pick_tb(B, T, H, itemsize, *, min_steps, max_block_bytes):
    """Batch-tile size: divisor of B, (multiple of 8 OR == B) so the (tb,H)/(tb,T) output
    blocks satisfy the sublane rule, at least `min_steps` grid steps where possible
    (v7x megacore), and the largest tile whose x block fits the VMEM block budget."""
    divs = [d for d in range(1, B + 1) if B % d == 0]
    aligned = [d for d in divs if d % 8 == 0 or d == B]             # always contains B
    cands = [d for d in aligned if B // d >= min_steps] or aligned
    fits = [d for d in cands if d * T * H * itemsize <= max_block_bytes]
    if not fits:
        # TODO(synk): for huge T*H where even the smallest aligned batch tile overflows the
        # budget, tile the time axis as a second ("arbitrary") grid dimension instead.
        fits = [min(cands)]
    return max(fits)


def self_attention(encoder_outputs, w1, b1, w2, b2=None, *, tb=None):
    """encoder_outputs: (B, T, H). Returns (outputs (B, H), weights (B, T)).

    b2 (the Linear(64,1) bias) is accepted for API parity with the nn.Module but not used:
    softmax is shift-invariant, so it cannot change the weights or outputs.
    Pass encoder_outputs (and params) as bf16 end-to-end to halve HBM traffic; internal
    matmul/softmax/accumulation stay f32.
    """
    B, T, H = encoder_outputs.shape
    P = w1.shape[1]                                                 # 64 in the module
    itemsize = jnp.dtype(encoder_outputs.dtype).itemsize

    budgets = _tpu_budgets()
    vmem_limit = budgets["vmem_limit"]
    try:  # clamp to physical VMEM if the query is available (extra safety on small parts)
        vmem_limit = min(vmem_limit, (pltpu.get_tpu_info().vmem_capacity_bytes * 3) // 4)
    except Exception:
        pass

    if tb is None:
        tb = _pick_tb(B, T, H, itemsize,
                      min_steps=budgets["min_steps"],
                      max_block_bytes=budgets["max_block_bytes"])
    assert B % tb == 0 and (tb % 8 == 0 or tb == B), \
        "batch tile must divide B and be a multiple of 8 (or equal to B)"

    b1_2d = b1.reshape(1, P)
    w2_row = w2.reshape(1, P)                                       # (64, 1) -> (1, 64) row

    n_steps = B // tb
    x_block_bytes = tb * T * H * itemsize
    if n_steps >= 3 and 3 * x_block_bytes <= vmem_limit // 2:
        # Deeper prefetch for the DMA-bound loop when there are enough steps + headroom.
        x_spec = pl.BlockSpec((tb, T, H), lambda b: (b, 0, 0),
                              pipeline_mode=pl.Buffered(3))
    else:
        x_spec = pl.BlockSpec((tb, T, H), lambda b: (b, 0, 0))

    out, wts = pl.pallas_call(
        _self_attn_kernel,
        out_shape=(
            jax.ShapeDtypeStruct((B, H), encoder_outputs.dtype),
            jax.ShapeDtypeStruct((B, T), encoder_outputs.dtype),
        ),
        grid_spec=pltpu.PrefetchScalarGridSpec(
            num_scalar_prefetch=0,
            grid=(n_steps,),
            in_specs=[
                x_spec,                                             # x batch tile
                pl.BlockSpec((H, P), lambda b: (0, 0)),             # W1 (full, resident)
                pl.BlockSpec((1, P), lambda b: (0, 0)),             # b1 row
                pl.BlockSpec((1, P), lambda b: (0, 0)),             # W2 as a row
            ],
            out_specs=[
                pl.BlockSpec((tb, H), lambda b: (b, 0)),            # pooled outputs
                pl.BlockSpec((tb, T), lambda b: (b, 0)),            # lane-dense weights
            ],
        ),
        compiler_params=pltpu.CompilerParams(
            dimension_semantics=("parallel",),
            vmem_limit_bytes=vmem_limit),
    )(encoder_outputs, w1, b1_2d, w2_row)

    return out, wts


def _reference(encoder_outputs, w1, b1, w2, b2):
    h = jnp.maximum(encoder_outputs @ w1 + b1, 0.0)                 # (B, T, 64)
    e = (h @ w2 + b2)[..., 0]                                       # (B, T)
    wts = jax.nn.softmax(e, axis=1)                                 # (B, T)
    out = jnp.sum(encoder_outputs * wts[..., None], axis=1)         # (B, H)
    return out, wts


if __name__ == "__main__":
    B, T, H = 16, 8, 32                                             # small demo shapes

    key = jax.random.PRNGKey(0)
    k_x, k_w1, k_b1, k_w2, k_b2 = jax.random.split(key, 5)

    x = jax.random.normal(k_x, (B, T, H), dtype=jnp.float32)
    # parameter shapes from nn.Linear(H, 64) / nn.Linear(64, 1)
    w1 = jax.random.normal(k_w1, (H, 64), dtype=jnp.float32) * 0.1
    b1 = jax.random.normal(k_b1, (64,), dtype=jnp.float32) * 0.1
    w2 = jax.random.normal(k_w2, (64, 1), dtype=jnp.float32) * 0.1
    b2 = jax.random.normal(k_b2, (1,), dtype=jnp.float32) * 0.1

    out, wts = self_attention(x, w1, b1, w2, b2)
    jax.block_until_ready((out, wts))

    out_ref, wts_ref = _reference(x, w1, b1, w2, b2)
    assert out.shape == (B, H) and wts.shape == (B, T)
    assert jnp.allclose(out, out_ref, atol=1e-5, rtol=1e-5)
    assert jnp.allclose(wts, wts_ref, atol=1e-5, rtol=1e-5)

    print("KERNEL_OK")
</pallas_src>

<mosaic_0001>
module attributes {stable_mosaic.version = 11 : i64} {
  func.func @_self_attn_kernel(%arg0: i32, %arg1: memref<16x8x32xf32, #tpu.memory_space<vmem>>, %arg2: memref<32x64xf32, #tpu.memory_space<vmem>>, %arg3: memref<1x64xf32, #tpu.memory_space<vmem>>, %arg4: memref<1x64xf32, #tpu.memory_space<vmem>>, %arg5: memref<16x32xf32, #tpu.memory_space<vmem>>, %arg6: memref<16x8xf32, #tpu.memory_space<vmem>>) attributes {dimension_semantics = [#tpu.dimension_semantics<parallel>], iteration_bounds = array<i64: 1>, scalar_prefetch = 0 : i64, scratch_operands = 0 : i64, tpu.core_type = #tpu.core_type<tc>, window_params = [{transform_indices = @transform_0, window_bounds = array<i64: 16, 8, 32>}, {pipeline_mode = #tpu.pipeline_mode<synchronous>, transform_indices = @transform_1, window_bounds = array<i64: 32, 64>}, {pipeline_mode = #tpu.pipeline_mode<synchronous>, transform_indices = @transform_2, window_bounds = array<i64: 1, 64>}, {pipeline_mode = #tpu.pipeline_mode<synchronous>, transform_indices = @transform_3, window_bounds = array<i64: 1, 64>}, {transform_indices = @transform_4, window_bounds = array<i64: 16, 32>}, {transform_indices = @transform_5, window_bounds = array<i64: 16, 8>}]} {
    %c0 = arith.constant 0 : index
    %c0_0 = arith.constant 0 : index
    %c0_1 = arith.constant 0 : index
    %0 = vector.load %arg1[%c0, %c0_0, %c0_1] : memref<16x8x32xf32, #tpu.memory_space<vmem>>, vector<16x8x32xf32>
    %1 = vector.shape_cast %0 : vector<16x8x32xf32> to vector<128x32xf32>
    %c0_2 = arith.constant 0 : index
    %c0_3 = arith.constant 0 : index
    %2 = vector.load %arg2[%c0_2, %c0_3] : memref<32x64xf32, #tpu.memory_space<vmem>>, vector<32x64xf32>
    %cst = arith.constant dense<0.000000e+00> : vector<128x64xf32>
    %3 = tpu.matmul %1, %2, %cst {dimension_numbers = #tpu.dot_dimension_numbers<[1], [0], [0], [1], [0, 0, 1, 1], [], []>} : vector<128x32xf32>, vector<32x64xf32>, vector<128x64xf32> -> vector<128x64xf32>
    %c0_4 = arith.constant 0 : index
    %c0_5 = arith.constant 0 : index
    %4 = vector.load %arg3[%c0_4, %c0_5] : memref<1x64xf32, #tpu.memory_space<vmem>>, vector<1x64xf32>
    %5 = vector.broadcast %4 : vector<1x64xf32> to vector<128x64xf32>
    %6 = arith.addf %3, %5 : vector<128x64xf32>
    %cst_6 = arith.constant 0.000000e+00 : f32
    %7 = vector.broadcast %cst_6 : f32 to vector<128x64xf32>
    %8 = arith.maximumf %6, %7 : vector<128x64xf32>
    %c0_7 = arith.constant 0 : index
    %c0_8 = arith.constant 0 : index
    %9 = vector.load %arg4[%c0_7, %c0_8] : memref<1x64xf32, #tpu.memory_space<vmem>>, vector<1x64xf32>
    %10 = vector.broadcast %9 : vector<1x64xf32> to vector<128x64xf32>
    %11 = arith.mulf %8, %10 : vector<128x64xf32>
    %12 = vector.shape_cast %11 : vector<128x64xf32> to vector<16x8x64xf32>
    %cst_9 = arith.constant dense<0.000000e+00> : vector<16x8xf32>
    %13 = vector.multi_reduction <add>, %12, %cst_9 [2] : vector<16x8x64xf32> to vector<16x8xf32>
    %cst_10 = arith.constant dense<0xFF800000> : vector<16xf32>
    %14 = vector.multi_reduction <maximumf>, %13, %cst_10 [1] : vector<16x8xf32> to vector<16xf32>
    %15 = vector.shape_cast %14 : vector<16xf32> to vector<16x1xf32>
    %16 = vector.broadcast %15 : vector<16x1xf32> to vector<16x8xf32>
    %17 = arith.subf %13, %16 : vector<16x8xf32>
    %18 = math.exp %17 : vector<16x8xf32>
    %cst_11 = arith.constant dense<0.000000e+00> : vector<16xf32>
    %19 = vector.multi_reduction <add>, %18, %cst_11 [1] : vector<16x8xf32> to vector<16xf32>
    %20 = vector.shape_cast %19 : vector<16xf32> to vector<16x1xf32>
    %21 = tpu.reciprocal %20 : vector<16x1xf32> -> vector<16x1xf32>
    %22 = vector.broadcast %21 : vector<16x1xf32> to vector<16x8xf32>
    %23 = arith.mulf %18, %22 : vector<16x8xf32>
    %24 = vector.shape_cast %23 : vector<16x8xf32> to vector<16x8x1xf32>
    %25 = vector.broadcast %24 : vector<16x8x1xf32> to vector<16x8x32xf32>
    %26 = arith.mulf %0, %25 : vector<16x8x32xf32>
    %cst_12 = arith.constant dense<0.000000e+00> : vector<16x32xf32>
    %27 = vector.multi_reduction <add>, %26, %cst_12 [1] : vector<16x8x32xf32> to vector<16x32xf32>
    %c0_13 = arith.constant 0 : index
    %c0_14 = arith.constant 0 : index
    %28 = vector.load %arg5[%c0_13, %c0_14] : memref<16x32xf32, #tpu.memory_space<vmem>>, vector<16x32xf32>
    tpu.vector_store %arg5[%c0_13, %c0_14], %27 {strides = array<i32>} : memref<16x32xf32, #tpu.memory_space<vmem>>, vector<16x32xf32>,
    %c0_15 = arith.constant 0 : index
    %c0_16 = arith.constant 0 : index
    %29 = vector.load %arg6[%c0_15, %c0_16] : memref<16x8xf32, #tpu.memory_space<vmem>>, vector<16x8xf32>
    tpu.vector_store %arg6[%c0_15, %c0_16], %23 {strides = array<i32>} : memref<16x8xf32, #tpu.memory_space<vmem>>, vector<16x8xf32>,
    return
  }
  func.func @transform_0(%arg0: i32) -> (i32, i32, i32) {
    %c0_i32 = arith.constant 0 : i32
    %c0_i32_0 = arith.constant 0 : i32
    %c0_i32_1 = arith.constant 0 : i32
    return %arg0, %c0_i32, %c0_i32_0 : i32, i32, i32
  }
  func.func @transform_1(%arg0: i32) -> (i32, i32) {
    %c0_i32 = arith.constant 0 : i32
    %c0_i32_0 = arith.constant 0 : i32
    %c0_i32_1 = arith.constant 0 : i32
    return %c0_i32, %c0_i32_0 : i32, i32
  }
  func.func @transform_2(%arg0: i32) -> (i32, i32) {
    %c0_i32 = arith.constant 0 : i32
    %c0_i32_0 = arith.constant 0 : i32
    %c0_i32_1 = arith.constant 0 : i32
    return %c0_i32, %c0_i32_0 : i32, i32
  }
  func.func @transform_3(%arg0: i32) -> (i32, i32) {
    %c0_i32 = arith.constant 0 : i32
    %c0_i32_0 = arith.constant 0 : i32
    %c0_i32_1 = arith.constant 0 : i32
    return %c0_i32, %c0_i32_0 : i32, i32
  }
  func.func @transform_4(%arg0: i32) -> (i32, i32) {
    %c0_i32 = arith.constant 0 : i32
    %c0_i32_0 = arith.constant 0 : i32
    return %arg0, %c0_i32 : i32, i32
  }
  func.func @transform_5(%arg0: i32) -> (i32, i32) {
    %c0_i32 = arith.constant 0 : i32
    %c0_i32_0 = arith.constant 0 : i32
    return %arg0, %c0_i32 : i32, i32
  }
}

</mosaic_0001>

<bundles_post_ra>
// kernel: tpu_custom_call.1
= control target key start
LH: loop header
LB: loop body
LE: loop exit
PB: predicated region body
PF: predicated region fallthrough
CT: control target
= control target key end

     0   :  { %11 = vsyncpa [#allocation3], 0  ;;  %s1925_s0 = inlined_call_operand.hbm [shape: f32[16,8,32], index: 0, kind: input, shape index: {}]   ;;  %s1926_s1 = inlined_call_operand.hbm [shape: f32[32,64], index: 1, kind: input, shape index: {}]   ;;  %s1927_s2 = inlined_call_operand.vmem [shape: f32[1,64], index: 2, kind: input, shape index: {}]   ;;  %s1928_s3 = inlined_call_operand.vmem [shape: f32[1,64], index: 3, kind: input, shape index: {}]   ;;  %s1929_s4 = inlined_call_operand.hbm [shape: f32[16,32], index: 4, kind: output, shape index: {0}]   ;;  %s1930_s5 = inlined_call_operand.vmem [shape: f32[16,8], index: 5, kind: output, shape index: {1}]  }
   0x1   :  { %12 = vsyncpa [#allocation6], 0 }
   0x2   :  { %13 = vsyncpa [#allocation4], 0  ;;  %s1384_s18 = smov [#allocation2]  }
   0x3   :  { %s19_s19 = sshll.u32 %s1384_s18, 4  ;;  %s20_s19 = int_to_ptr.vmem [resolvable:$true] %s19_s19 }
   0x4   :  { %s1326_s20 = scalar_lea.vmem %s20_s19, 2048  ;;  %p1331_p1 = scmp.lt.s32.totalorder %s20_s19, %s20_s19 }
   0x5   :  { %p1327_p0 = scmp.ne.s32.totalorder %s20_s19, %s1326_s20  ;;  %p1332_p2 = scmp.lt.s32.totalorder %s1326_s20, %s1326_s20 }
   0x7   :  { %p1333_p3 = por %p1332_p2, %p1331_p1 }
   0x9   :  { %p1334_p4 = pnand %p1333_p3, %p1327_p0 }
   0xb   :  { %1337 = shalt.err (!%p1334_p4)
}
   0xc   :  { %s1385_s21 = smov 128   ;;  %s1386_s22 = smov 8  }
   0xd   :  { %25 = dma.hbm_to_vmem [thread:$0]  %s1925_s0, 2048, %s20_s19, [#allocation3], %s1385_s21, %s1385_s21, %s1386_s22  }
   0xe   :  { %s1387_s25 = smov [#allocation5]  }
   0xf   :  { %s31_s26 = sshll.u32 %s1387_s25, 4  ;;  %s32_s26 = int_to_ptr.vmem [resolvable:$true] %s31_s26 }
  0x10   :  { %s1346_s27 = scalar_lea.vmem %s32_s26, 512  ;;  %p1351_p6 = scmp.lt.s32.totalorder %s32_s26, %s32_s26 }
  0x11   :  { %p1347_p5 = scmp.ne.s32.totalorder %s32_s26, %s1346_s27  ;;  %p1352_p7 = scmp.lt.s32.totalorder %s1346_s27, %s1346_s27 }
  0x13   :  { %p1353_p8 = por %p1352_p7, %p1351_p6 }
  0x15   :  { %p1354_p9 = pnand %p1353_p8, %p1347_p5 }
  0x17   :  { %1357 = shalt.err (!%p1354_p9)
}
  0x18   :  { %37 = dma.hbm_to_vmem [thread:$0]  %s1926_s1, 512, %s32_s26, [#allocation6], %s1385_s21, %s1385_s21, %s1386_s22  }
  0x19   :  { %1378 = dma.done.wait [#allocation3], 2048  }
  0x1a   :  { %1379 = vsyncadd [#allocation3], 4294965248 }
  0x1b   :  { %1380 = dma.done.wait [#allocation6], 512  }
  0x1c   :  { %1381 = vsyncadd [#allocation6], 4294966784  ;;  %v67_v0 = vld [vmem:[#allocation5 + $0x18] sm:$0xff]  ;;  %v66_v1 = vld [vmem:[#allocation5 + $0x10] sm:$0xff]  ;;  %vm75_vm0 = vcmask 261120   ;;  %vm308_vm1 = vcmask 523264  }
  0x1d   :  { %1233 = vmatprep.subr.mxu0 %v67_v0  ;;  %1265 = vmatprep.subr.mxu1 %v67_v0  ;;  %v65_v2 = vld [vmem:[#allocation5 + $0x8] sm:$0xff]  ;;  %v64_v3 = vld [vmem:[#allocation5] sm:$0xff]  ;;  %v1440_v8 = vld [vmem:[#allocation2 + $0x10] sm:$0xff]  ;;  %vm439_vm2 = vcmask 1041409   ;;  %vm441_vm3 = vcmask 1042434   ;;  %vm443_vm4 = vcmask 1043459  }
  0x1e   :  { %1234 = vmatpush3.msra.mxu0 %v67_v0  ;;  %1269 = vmatpush3.msra.mxu1 %v67_v0  ;;  %v1432_v4 = vld [vmem:[#allocation2] sm:$0xff]  ;;  %v1436_v6 = vld [vmem:[#allocation2 + $0x8] sm:$0xff]  ;;  %v1442_v9 = vld [vmem:[#allocation2 + $0x50] sm:$0xff]  ;;  %vm445_vm5 = vcmask 1044484   ;;  %vm447_vm6 = vcmask 1045509   ;;  %vm449_vm7 = vcmask 1046534  }
  0x1f   :  { %1235 = vmatprep.subr.mxu0 %v66_v1  ;;  %1266 = vmatprep.subr.mxu1 %v66_v1  ;;  %v1434_v5 = vld [vmem:[#allocation2 + $0x40] sm:$0xff]  ;;  %v1438_v7 = vld [vmem:[#allocation2 + $0x48] sm:$0xff]  ;;  %v1454_v10 = vld [vmem:[#allocation2 + $0x18] sm:$0xff]  ;;  %vm451_vm8 = vcmask 1047559   ;;  %vm462_vm9 = vcmask 64512  }
  0x20   :  { %1236 = vmatpush3.msra.mxu0 %v66_v1  ;;  %1270 = vmatpush3.msra.mxu1 %v66_v1  ;;  %v1458_v11 = vld [vmem:[#allocation2 + $0x58] sm:$0xff]  ;;  %v1460_v12 = vld [vmem:[#allocation2 + $0x20] sm:$0xff]  ;;  %v1470_v14 = vld [vmem:[#allocation2 + $0x28] sm:$0xff] }
  0x21   :  { %1237 = vmatprep.subr.mxu0 %v65_v2  ;;  %1267 = vmatprep.subr.mxu1 %v65_v2  ;;  %v1462_v13 = vld [vmem:[#allocation2 + $0x60] sm:$0xff]  ;;  %v1474_v15 = vld [vmem:[#allocation2 + $0x68] sm:$0xff]  ;;  %v1476_v16 = vld [vmem:[#allocation2 + $0x30] sm:$0xff] }
  0x22   :  { %1238 = vmatpush3.msra.mxu0 %v65_v2  ;;  %1271 = vmatpush3.msra.mxu1 %v65_v2  ;;  %v1478_v17 = vld [vmem:[#allocation2 + $0x70] sm:$0xff]  ;;  %v1486_v18 = vld [vmem:[#allocation2 + $0x38] sm:$0xff]  ;;  %v1496_v20 = vld [vmem:[%s1927_s2] ss:$0 sm:$0xff] }
  0x23   :  { %1239 = vmatprep.subr.mxu0 %v64_v3  ;;  %1268 = vmatprep.subr.mxu1 %v64_v3  ;;  %v63_v19 = vld [vmem:[#allocation2 + $0x78] sm:$0xff]  ;;  %v1503_v27 = vld [vmem:[%s1928_s3] ss:$0 sm:$0xff] }
  0x24   :  { %1240 = vmatpush3.msra.mxu0 %v64_v3  ;;  %1272 = vmatpush3.msra.mxu1 %v64_v3 }
  0x25   :  { %1241 = vmatprep.mubr.msk.f32.mxu0 %vm75_vm0, %v1432_v4  ;;  %1253 = vmatprep.mubr.msk.f32.mxu1 %vm75_vm0, %v1434_v5 }
  0x26   :  { %1242 = vmatmul.mubr.msk.f32.vlgmr.msra.gmra.mxu0 %vm75_vm0, %v1436_v6  ;;  %1254 = vmatmul.mubr.msk.f32.vlgmr.msra.gmra.mxu1 %vm75_vm0, %v1438_v7 }
  0x27   :  { %1244 = vmatprep.mubr.msk.f32.mxu0 %vm75_vm0, %v1440_v8  ;;  %1256 = vmatprep.mubr.msk.f32.mxu1 %vm75_vm0, %v1442_v9 }
  0x2a   :  { %1245 = vmatmul.mubr.msk.f32.gmra.mxu0 %vm75_vm0, %v1454_v10  ;;  %1257 = vmatmul.mubr.msk.f32.gmra.mxu1 %vm75_vm0, %v1458_v11 }
  0x2b   :  { %1247 = vmatprep.mubr.msk.f32.mxu0 %vm75_vm0, %v1460_v12  ;;  %1259 = vmatprep.mubr.msk.f32.mxu1 %vm75_vm0, %v1462_v13 }
  0x2e   :  { %1248 = vmatmul.mubr.msk.f32.gmra.mxu0 %vm75_vm0, %v1470_v14  ;;  %1260 = vmatmul.mubr.msk.f32.gmra.mxu1 %vm75_vm0, %v1474_v15 }
  0x2f   :  { %1250 = vmatprep.mubr.msk.f32.mxu0 %vm75_vm0, %v1476_v16  ;;  %1262 = vmatprep.mubr.msk.f32.mxu1 %vm75_vm0, %v1478_v17 }
  0x32   :  { %1251 = vmatmul.mubr.msk.f32.gmra.mxu0 %vm75_vm0, %v1486_v18  ;;  %1263 = vmatmul.mubr.msk.f32.gmra.mxu1 %vm75_vm0, %v63_v19 }
  0xe6   :  { %v1243_v21 = vpop.f32.mrf.mxu0  ;;  %v1255_v22 = vpop.f32.mrf.mxu1 }
  0xe7   :  { %v196_v23 = vadd.f32 %v1243_v21, %v1496_v20  ;;  %v236_v24 = vadd.f32 %v1255_v22, %v1496_v20 }
  0xe8   :  { %v190_v25 = vpop.f32.mrf.mxu0  ;;  %v230_v26 = vpop.f32.mrf.mxu1 }
  0xe9   :  { %v270_v28 = vmax.f32 %v196_v23, 0.0  ;;  %v278_v29 = vmax.f32 %v236_v24, 0.0  ;;  %v191_v30 = vadd.f32 %v1496_v20, %v190_v25  ;;  %v231_v31 = vadd.f32 %v1496_v20, %v230_v26 }
  0xea   :  { %v1246_v32 = vpop.f32.mrf.mxu0  ;;  %v1258_v33 = vpop.f32.mrf.mxu1 }
  0xeb   :  { %v269_v34 = vmax.f32 %v191_v30, 0.0  ;;  %v277_v35 = vmax.f32 %v231_v31, 0.0  ;;  %v206_v36 = vadd.f32 %v1246_v32, %v1496_v20  ;;  %v301_v37 = vmul.f32 %v1503_v27, %v278_v29 }
  0xec   :  { %v246_v38 = vadd.f32 %v1258_v33, %v1496_v20  ;;  %v293_v39 = vmul.f32 %v1503_v27, %v270_v28  ;;  %v200_v40 = vpop.f32.mrf.mxu0  ;;  %v240_v41 = vpop.f32.mrf.mxu1 }
  0xed   :  { %v272_v42 = vmax.f32 %v206_v36, 0.0  ;;  %v336_v43 = vsel %vm308_vm1, %v301_v37, 0.0  ;;  %v201_v44 = vadd.f32 %v1496_v20, %v200_v40  ;;  %v241_v45 = vadd.f32 %v1496_v20, %v240_v41 }
  0xee   :  { %337 = vadd.xlane.f32.xlu1 %v336_v43  ;;  %v280_v46 = vmax.f32 %v246_v38, 0.0  ;;  %v312_v47 = vsel %vm308_vm1, %v293_v39, 0.0  ;;  %v300_v48 = vmul.f32 %v1503_v27, %v277_v35  ;;  %v292_v49 = vmul.f32 %v1503_v27, %v269_v34  ;;  %v1249_v50 = vpop.f32.mrf.mxu0  ;;  %v1261_v51 = vpop.f32.mrf.mxu1 }
  0xef   :  { %313 = vadd.xlane.f32.xlu0 %v312_v47  ;;  %v279_v52 = vmax.f32 %v241_v45, 0.0  ;;  %v256_v53 = vadd.f32 %v1261_v51, %v1496_v20  ;;  %v216_v55 = vadd.f32 %v1249_v50, %v1496_v20  ;;  %v295_v57 = vmul.f32 %v1503_v27, %v272_v42 }
  0xf0   :  { %v333_v54 = vsel %vm308_vm1, %v300_v48, 0.0  ;;  %v303_v56 = vmul.f32 %v1503_v27, %v280_v46  ;;  %v250_v58 = vpop.f32.mrf.mxu1  ;;  %v210_v59 = vpop.f32.mrf.mxu0  ;;  %v271_v60 = vmax.f32 %v201_v44, 0.0  ;;  %v309_v61 = vsel %vm308_vm1, %v292_v49, 0.0 }
  0xf1   :  { %v282_v63 = vmax.f32 %v256_v53, 0.0  ;;  %v251_v1 = vadd.f32 %v1496_v20, %v250_v58  ;;  %v302_v2 = vmul.f32 %v1503_v27, %v279_v52  ;;  %v274_v19 = vmax.f32 %v216_v55, 0.0 }
  0xf2   :  { %334 = vadd.xlane.f32.xlu1 %v333_v54  ;;  %v1264_v62 = vpop.f32.mrf.mxu1  ;;  %v342_v0 = vsel %vm308_vm1, %v303_v56, 0.0  ;;  %v1252_v3 = vpop.f32.mrf.mxu0  ;;  %v318_v21 = vsel %vm308_vm1, %v295_v57, 0.0  ;;  %v211_v23 = vadd.f32 %v1496_v20, %v210_v59  ;;  %v294_v24 = vmul.f32 %v1503_v27, %v271_v60 }
  0xf3   :  { %310 = vadd.xlane.f32.xlu0 %v309_v61  ;;  %v281_v25 = vmax.f32 %v251_v1, 0.0  ;;  %v339_v26 = vsel %vm308_vm1, %v302_v2, 0.0  ;;  %v305_v30 = vmul.f32 %v1503_v27, %v282_v63  ;;  %v297_v31 = vmul.f32 %v1503_v27, %v274_v19 }
  0xf4   :  { %v260_v22 = vpop.f32.mrf.mxu1  ;;  %v220_v28 = vpop.f32.mrf.mxu0  ;;  %v273_v32 = vmax.f32 %v211_v23, 0.0  ;;  %v315_v33 = vsel %vm308_vm1, %v294_v24, 0.0  ;;  %v266_v39 = vadd.f32 %v1264_v62, %v1496_v20  ;;  %v226_v40 = vadd.f32 %v1252_v3, %v1496_v20 }
  0xf5   :  { %v261_v29 = vadd.f32 %v1496_v20, %v260_v22  ;;  %v221_v34 = vadd.f32 %v1496_v20, %v220_v28  ;;  %v348_v36 = vsel %vm308_vm1, %v305_v30, 0.0  ;;  %v304_v37 = vmul.f32 %v1503_v27, %v281_v25 }
  0xf6   :  { %343 = vadd.xlane.f32.xlu1 %v342_v0  ;;  %v324_v38 = vsel %vm308_vm1, %v297_v31, 0.0  ;;  %v296_v42 = vmul.f32 %v1503_v27, %v273_v32  ;;  %v284_v45 = vmax.f32 %v266_v39, 0.0  ;;  %v276_v46 = vmax.f32 %v226_v40, 0.0 }
  0xf7   :  { %319 = vadd.xlane.f32.xlu0 %v318_v21  ;;  %v283_v35 = vmax.f32 %v261_v29, 0.0  ;;  %v275_v41 = vmax.f32 %v221_v34, 0.0  ;;  %v345_v43 = vsel %vm308_vm1, %v304_v37, 0.0  ;;  %v373_v58 = vlaneseq }
  0xf8   :  { %v321_v47 = vsel %vm308_vm1, %v296_v42, 0.0  ;;  %v307_v20 = vmul.f32 %v1503_v27, %v284_v45  ;;  %v299_v51 = vmul.f32 %v1503_v27, %v276_v46 }
  0xf9   :  { %v306_v44 = vmul.f32 %v1503_v27, %v283_v35  ;;  %v298_v48 = vmul.f32 %v1503_v27, %v275_v41  ;;  %v374_v27 = vand.u32 127, %v373_v58  ;;  %v1563_v61 = vshrl.u32 %v373_v58, 7 }
  0xfa   :  { %340 = vadd.xlane.f32.xlu1 %v339_v26  ;;  %v354_v52 = vsel %vm308_vm1, %v307_v20, 0.0  ;;  %v330_v53 = vsel %vm308_vm1, %v299_v51, 0.0 }
  0xfb   :  { %316 = vadd.xlane.f32.xlu0 %v315_v33  ;;  %v351_v49 = vsel %vm308_vm1, %v306_v44, 0.0  ;;  %v327_v50 = vsel %vm308_vm1, %v298_v48, 0.0  ;;  %v1570_v0 = vsub.s32 %v374_v27, %v1563_v61 }
  0xfe   :  { %349 = vadd.xlane.f32.xlu1 %v348_v36 }
  0xff   :  { %325 = vadd.xlane.f32.xlu0 %v324_v38 }
 0x102   :  { %346 = vadd.xlane.f32.xlu1 %v345_v43 }
 0x103   :  { %322 = vadd.xlane.f32.xlu0 %v321_v47 }
 0x106   :  { %352 = vadd.xlane.f32.xlu1 %v351_v49 }
 0x107   :  { %328 = vadd.xlane.f32.xlu0 %v327_v50 }
 0x10a   :  { %355 = vadd.xlane.f32.xlu1 %v354_v52 }
 0x10b   :  { %331 = vadd.xlane.f32.xlu0 %v330_v53 }
 0x177   :  { %v1551_v54 = vpop.xlane.xlu1 %337 }
 0x178   :  { %v1553_v55 = vpop.xlane.xlu0 %313  ;;  %v414_v2 = vrot.slane %v1551_v54, %v1570_v0 }
 0x179   :  { %v382_v24 = vrot.slane %v1553_v55, %v1570_v0 }
 0x17b   :  { %v1555_v56 = vpop.xlane.xlu1 %334 }
 0x17c   :  { %v1557_v57 = vpop.xlane.xlu0 %310  ;;  %v410_v3 = vrot.slane %v1555_v56, %v1570_v0 }
 0x17d   :  { %v378_v21 = vrot.slane %v1557_v57, %v1570_v0 }
 0x17e   :  { %v453_v26 = vsel %vm439_vm2, %v414_v2, %v410_v3  ;;  %v1388_v3 = vmov 0  }
 0x17f   :  { %v1559_v59 = vpop.xlane.xlu1 %343  ;;  %v440_v30 = vsel %vm439_vm2, %v382_v24, %v378_v21  ;;  %1280 = vset.pattern.permute.xlu1 %v1388_v3  ;;  %1279 = vset.pattern.permute.xlu0 %v1388_v3  ;;  %v1628_v21 = vsub.s32 0, %v1563_v61  ;;  %v1636_v24 = vsub.s32 4, %v1563_v61 }
 0x180   :  { %v1561_v60 = vpop.xlane.xlu0 %319  ;;  %v422_v28 = vrot.slane %v1559_v59, %v1570_v0 }
 0x181   :  { %v390_v35 = vrot.slane %v1561_v60, %v1570_v0 }
 0x183   :  { %v1565_v62 = vpop.xlane.xlu1 %340 }
 0x184   :  { %v1567_v63 = vpop.xlane.xlu0 %316  ;;  %v418_v22 = vrot.slane %v1565_v62, %v1570_v0 }
 0x185   :  { %v386_v23 = vrot.slane %v1567_v63, %v1570_v0 }
 0x186   :  { %v454_v31 = vsel %vm441_vm3, %v418_v22, %v453_v26  ;;  %v1631_v22 = vsub.s32 1, %v1563_v61 }
 0x187   :  { %v1572_v1 = vpop.xlane.xlu1 %349  ;;  %v442_v33 = vsel %vm441_vm3, %v386_v23, %v440_v30  ;;  %v455_v38 = vsel %vm443_vm4, %v422_v28, %v454_v31  ;;  %v1643_v31 = vsub.s32 5, %v1563_v61 }
 0x188   :  { %v1578_v19 = vpop.xlane.xlu0 %325  ;;  %v430_v37 = vrot.slane %v1572_v1, %v1570_v0  ;;  %v444_v41 = vsel %vm443_vm4, %v390_v35, %v442_v33 }
 0x189   :  { %v398_v45 = vrot.slane %v1578_v19, %v1570_v0 }
 0x18b   :  { %v347_v25 = vpop.xlane.xlu1 %346 }
 0x18c   :  { %v1591_v29 = vpop.xlane.xlu0 %322  ;;  %v426_v32 = vrot.slane %v347_v25, %v1570_v0 }
 0x18d   :  { %v394_v34 = vrot.slane %v1591_v29, %v1570_v0 }
 0x18e   :  { %v456_v40 = vsel %vm445_vm5, %v426_v32, %v455_v38  ;;  %v1653_v38 = vsub.s32 6, %v1563_v61 }
 0x18f   :  { %v353_v36 = vpop.xlane.xlu1 %352  ;;  %v446_v43 = vsel %vm445_vm5, %v394_v34, %v444_v41  ;;  %v457_v49 = vsel %vm447_vm6, %v430_v37, %v456_v40  ;;  %v1650_v37 = vsub.s32 2, %v1563_v61 }
 0x190   :  { %v1604_v39 = vpop.xlane.xlu0 %328  ;;  %v434_v42 = vrot.slane %v353_v36, %v1570_v0  ;;  %v448_v51 = vsel %vm447_vm6, %v398_v45, %v446_v43 }
 0x191   :  { %v402_v44 = vrot.slane %v1604_v39, %v1570_v0 }
 0x192   :  { %v458_v50 = vsel %vm449_vm7, %v434_v42, %v457_v49 }
 0x193   :  { %v356_v46 = vpop.xlane.xlu1 %355  ;;  %v450_v53 = vsel %vm449_vm7, %v402_v44, %v448_v51 }
 0x194   :  { %v438_v47 = vrot.slane %v356_v46, %v1570_v0  ;;  %v1615_v48 = vpop.xlane.xlu0 %331 }
 0x195   :  { %v406_v20 = vrot.slane %v1615_v48, %v1570_v0 }
 0x196   :  { %v459_v52 = vsel %vm451_vm8, %v438_v47, %v458_v50  ;;  %v1659_v47 = vsub.s32 7, %v1563_v61 }
 0x197   :  { %v466_v58 = vsel %vm462_vm9, %v459_v52, -inf  ;;  %v452_v27 = vsel %vm451_vm8, %v406_v20, %v450_v53 }
 0x198   :  { %467 = vmax.xlane.f32.xlu1 %v466_v58  ;;  %v463_v2 = vsel %vm462_vm9, %v452_v27, -inf }
 0x199   :  { %464 = vmax.xlane.f32.xlu0 %v463_v2 }
 0x221   :  { %v468_v26 = vpop.xlane.xlu1 %467 }
 0x222   :  { %v1633_v23 = vpop.xlane.xlu0 %464  ;;  %v522_v32 = vrot.slane %v468_v26, %v1636_v24  ;;  %v506_v33 = vrot.slane %v468_v26, %v1628_v21  ;;  %v526_v40 = vrot.slane %v468_v26, %v1643_v31  ;;  %v510_v42 = vrot.slane %v468_v26, %v1631_v22 }
 0x223   :  { %v474_v28 = vrot.slane %v1633_v23, %v1628_v21  ;;  %v478_v30 = vrot.slane %v1633_v23, %v1631_v22  ;;  %v534_v51 = vrot.slane %v468_v26, %v1659_v47  ;;  %v514_v58 = vrot.slane %v468_v26, %v1650_v37 }
 0x224   :  { %v563_v41 = vsub.f32 %v347_v25, %v522_v32  ;;  %v559_v43 = vsub.f32 %v1555_v56, %v506_v33  ;;  %v560_v20 = vsub.f32 %v1551_v54, %v510_v42  ;;  %v482_v25 = vrot.slane %v1633_v23, %v1650_v37 }
 0x225   :  { %v551_v34 = vsub.f32 %v1557_v57, %v474_v28  ;;  %v552_v35 = vsub.f32 %v1553_v55, %v478_v30  ;;  %v530_v55 = vrot.slane %v468_v26, %v1653_v38  ;;  %v564_v57 = vsub.f32 %v1572_v1, %v526_v40 }
 0x226   :  { %v591_v49 = vmul.f32 1.442695, %v563_v41  ;;  %v583_v50 = vmul.f32 1.442695, %v559_v43  ;;  %v1667_v56 = vsub.s32 3, %v1563_v61  ;;  %v553_v27 = vsub.f32 %v1567_v63, %v482_v25 }
 0x227   :  { %v567_v44 = vmul.f32 1.442695, %v551_v34  ;;  %v569_v45 = vmul.f32 1.442695, %v552_v35  ;;  %v565_v52 = vsub.f32 %v353_v36, %v530_v55  ;;  %v593_v53 = vmul.f32 1.442695, %v564_v57 }
 0x228   :  { %v585_v1 = vmul.f32 1.442695, %v560_v20  ;;  %v566_v54 = vsub.f32 %v356_v46, %v534_v51  ;;  %v561_v3 = vsub.f32 %v1565_v62, %v514_v58  ;;  %v486_v61 = vrot.slane %v1633_v23, %v1667_v56 }
 0x229   :  { %1281 = vpow2.f32 %v567_v44  ;;  %v595_v2 = vmul.f32 1.442695, %v565_v52  ;;  %v571_v28 = vmul.f32 1.442695, %v553_v27  ;;  %v518_v32 = vrot.slane %v468_v26, %v1667_v56 }
 0x22a   :  { %1283 = vpow2.f32 %v569_v45  ;;  %v597_v36 = vmul.f32 1.442695, %v566_v54  ;;  %v587_v33 = vmul.f32 1.442695, %v561_v3  ;;  %v554_v34 = vsub.f32 %v1561_v60, %v486_v61 }
 0x22b   :  { %1285 = vpow2.f32 %v591_v49  ;;  %v562_v46 = vsub.f32 %v1559_v59, %v518_v32  ;;  %v490_v35 = vrot.slane %v1633_v23, %v1636_v24  ;;  %v494_v42 = vrot.slane %v1633_v23, %v1643_v31 }
 0x22c   :  { %1287 = vpow2.f32 %v583_v50  ;;  %v573_v26 = vmul.f32 1.442695, %v554_v34  ;;  %v498_v45 = vrot.slane %v1633_v23, %v1653_v38  ;;  %v502_v20 = vrot.slane %v1633_v23, %v1659_v47 }
 0x22d   :  { %1289 = vpow2.f32 %v593_v53  ;;  %v589_v41 = vmul.f32 1.442695, %v562_v46  ;;  %v555_v43 = vsub.f32 %v1591_v29, %v490_v35  ;;  %v556_v55 = vsub.f32 %v1578_v19, %v494_v42 }
 0x22e   :  { %1291 = vpow2.f32 %v585_v1  ;;  %v557_v50 = vsub.f32 %v1604_v39, %v498_v45  ;;  %v558_v19 = vsub.f32 %v1615_v48, %v502_v20 }
 0x22f   :  { %1293 = vpow2.f32 %v595_v2  ;;  %v575_v57 = vmul.f32 1.442695, %v555_v43  ;;  %v577_v25 = vmul.f32 1.442695, %v556_v55 }
 0x230   :  { %1295 = vpow2.f32 %v571_v28  ;;  %v579_v52 = vmul.f32 1.442695, %v557_v50  ;;  %v581_v23 = vmul.f32 1.442695, %v558_v19 }
 0x231   :  { %1297 = vpow2.f32 %v597_v36 }
 0x232   :  { %1299 = vpow2.f32 %v587_v33 }
 0x233   :  { %1301 = vpow2.f32 %v573_v26 }
 0x234   :  { %1303 = vpow2.f32 %v589_v41 }
 0x235   :  { %1305 = vpow2.f32 %v575_v57 }
 0x236   :  { %v1675_v30 = vpop.eup %1281  ;;  %1307 = vpow2.f32 %v577_v25 }
 0x237   :  { %v1679_v63 = vpop.eup %1283  ;;  %616 = vperm.xlu0 %1279, %v1675_v30   ;;  %1309 = vpow2.f32 %v579_v52 }
 0x238   :  { %619 = vperm.xlu1 %1280, %v1679_v63   ;;  %v1683_v62 = vpop.eup %1285  ;;  %1311 = vpow2.f32 %v581_v23 }
 0x239   :  { %v1688_v40 = vpop.eup %1287 }
 0x23a   :  { %v1692_v60 = vpop.eup %1289 }
 0x23b   :  { %652 = vperm.xlu0 %1279, %v1683_v62   ;;  %v1697_v59 = vpop.eup %1291 }
 0x23c   :  { %640 = vperm.xlu1 %1280, %v1688_v40   ;;  %v1701_v44 = vpop.eup %1293 }
 0x23d   :  { %v1706_v49 = vpop.eup %1295 }
 0x23e   :  { %v1710_v29 = vpop.eup %1297 }
 0x23f   :  { %655 = vperm.xlu0 %1279, %v1692_v60   ;;  %v1715_v51 = vpop.eup %1299 }
 0x240   :  { %643 = vperm.xlu1 %1280, %v1697_v59   ;;  %v1720_v53 = vpop.eup %1301 }
 0x241   :  { %v1723_v58 = vpop.eup %1303 }
 0x242   :  { %v1726_v39 = vpop.eup %1305 }
 0x243   :  { %658 = vperm.xlu0 %1279, %v1701_v44   ;;  %v1729_v1 = vpop.eup %1307 }
 0x244   :  { %622 = vperm.xlu1 %1280, %v1706_v49   ;;  %v1732_v48 = vpop.eup %1309 }
 0x245   :  { %v1735_v27 = vpop.eup %1311 }
 0x247   :  { %661 = vperm.xlu0 %1279, %v1710_v29  }
 0x248   :  { %646 = vperm.xlu1 %1280, %v1715_v51  }
 0x24c   :  { %625 = vperm.xlu1 %1280, %v1720_v53  }
 0x250   :  { %649 = vperm.xlu1 %1280, %v1723_v58  }
 0x254   :  { %628 = vperm.xlu1 %1280, %v1726_v39  }
 0x258   :  { %631 = vperm.xlu1 %1280, %v1729_v1  }
 0x25c   :  { %634 = vperm.xlu1 %1280, %v1732_v48  }
 0x260   :  { %637 = vperm.xlu1 %1280, %v1735_v27  }
 0x2b2   :  { %v617_v2 = vpop.permute.xlu0 %616 }
 0x2b3   :  { %v620_v54 = vpop.permute.xlu1 %619 }
 0x2b6   :  { %v653_v61 = vpop.permute.xlu0 %652 }
 0x2b7   :  { %v641_v3 = vpop.permute.xlu1 %640  ;;  %v714_v55 = vrot.slane %v653_v61, %v1570_v0 }
 0x2b8   :  { %v698_v41 = vrot.slane %v641_v3, %v1570_v0 }
 0x2ba   :  { %v656_v32 = vpop.permute.xlu0 %655 }
 0x2bb   :  { %v644_v28 = vpop.permute.xlu1 %643  ;;  %v718_v50 = vrot.slane %v656_v32, %v1570_v0  ;;  %v670_v32 = vrot.slane %v620_v54, %v1570_v0 }
 0x2bc   :  { %v702_v35 = vrot.slane %v644_v28, %v1570_v0 }
 0x2be   :  { %v659_v34 = vpop.permute.xlu0 %658  ;;  %v734_v43 = vsel %vm439_vm2, %v702_v35, %v698_v41  ;;  %v666_v41 = vrot.slane %v617_v2, %v1570_v0 }
 0x2bf   :  { %v623_v36 = vpop.permute.xlu1 %622  ;;  %v722_v19 = vrot.slane %v659_v34, %v1570_v0 }
 0x2c0   :  { %v674_v34 = vrot.slane %v623_v36, %v1570_v0 }
 0x2c2   :  { %v662_v20 = vpop.permute.xlu0 %661 }
 0x2c3   :  { %v647_v33 = vpop.permute.xlu1 %646  ;;  %v726_v3 = vrot.slane %v662_v20, %v1570_v0 }
 0x2c4   :  { %v706_v26 = vrot.slane %v647_v33, %v1570_v0 }
 0x2c6   :  { %v735_v57 = vsel %vm441_vm3, %v706_v26, %v734_v43 }
 0x2c7   :  { %v626_v46 = vpop.permute.xlu1 %625 }
 0x2cb   :  { %v650_v42 = vpop.permute.xlu1 %649 }
 0x2cc   :  { %v710_v45 = vrot.slane %v650_v42, %v1570_v0  ;;  %v678_v42 = vrot.slane %v626_v46, %v1570_v0 }
 0x2ce   :  { %v736_v25 = vsel %vm443_vm4, %v710_v45, %v735_v57 }
 0x2cf   :  { %v737_v52 = vsel %vm445_vm5, %v714_v55, %v736_v25  ;;  %v629_v23 = vpop.permute.xlu1 %628  ;;  %v727_v55 = vsel %vm439_vm2, %v670_v32, %v666_v41 }
 0x2d0   :  { %v738_v28 = vsel %vm447_vm6, %v718_v50, %v737_v52  ;;  %v682_v43 = vrot.slane %v629_v23, %v1570_v0  ;;  %v728_v20 = vsel %vm441_vm3, %v674_v34, %v727_v55 }
 0x2d1   :  { %v739_v33 = vsel %vm449_vm7, %v722_v19, %v738_v28  ;;  %v729_v54 = vsel %vm443_vm4, %v678_v42, %v728_v20 }
 0x2d2   :  { %v740_v61 = vsel %vm451_vm8, %v726_v3, %v739_v33  ;;  %v730_v2 = vsel %vm445_vm5, %v682_v43, %v729_v54 }
 0x2d3   :  { %v632_v35 = vpop.permute.xlu1 %631  ;;  %v746_v26 = vsel %vm462_vm9, %v740_v61, 0.0 }
 0x2d4   :  { %747 = vadd.xlane.f32.xlu0 %v746_v26  ;;  %v686_v57 = vrot.slane %v632_v35, %v1570_v0 }
 0x2d6   :  { %v731_v36 = vsel %vm447_vm6, %v686_v57, %v730_v2 }
 0x2d7   :  { %v635_v45 = vpop.permute.xlu1 %634 }
 0x2d8   :  { %v690_v50 = vrot.slane %v635_v45, %v1570_v0 }
 0x2da   :  { %v732_v19 = vsel %vm449_vm7, %v690_v50, %v731_v36 }
 0x2db   :  { %v638_v25 = vpop.permute.xlu1 %637 }
 0x2dc   :  { %v694_v46 = vrot.slane %v638_v25, %v1570_v0 }
 0x2de   :  { %v733_v52 = vsel %vm451_vm8, %v694_v46, %v732_v19 }
 0x2df   :  { %v743_v23 = vsel %vm462_vm9, %v733_v52, 0.0 }
 0x2e0   :  { %744 = vadd.xlane.f32.xlu1 %v743_v23 }
 0x35d   :  { %v748_v3 = vpop.xlane.xlu0 %747 }
 0x35e   :  { %1313 = vrcp.f32 %v748_v3 }
 0x369   :  { %v745_v28 = vpop.xlane.xlu1 %744 }
 0x36a   :  { %1315 = vrcp.f32 %v745_v28 }
 0x36b   :  { %v1314_v33 = vpop.eup %1313 }
 0x36c   :  { %v792_v34 = vrot.slane %v1314_v33, %v1631_v22  ;;  %v788_v42 = vrot.slane %v1314_v33, %v1628_v21  ;;  %v796_v55 = vrot.slane %v1314_v33, %v1650_v37  ;;  %v804_v20 = vrot.slane %v1314_v33, %v1636_v24 }
 0x36d   :  { %v808_v50 = vrot.slane %v1314_v33, %v1643_v31  ;;  %v812_v54 = vrot.slane %v1314_v33, %v1653_v38  ;;  %v816_v2 = vrot.slane %v1314_v33, %v1659_v47 }
 0x36e   :  { %v842_v43 = vmul.f32 %v1697_v59, %v792_v34  ;;  %v841_v45 = vmul.f32 %v1688_v40, %v788_v42 }
 0x377   :  { %v1316_v61 = vpop.eup %1315 }
 0x378   :  { %v760_v35 = vrot.slane %v1316_v61, %v1631_v22  ;;  %v756_v26 = vrot.slane %v1316_v61, %v1628_v21  ;;  %v764_v57 = vrot.slane %v1316_v61, %v1650_v37  ;;  %v800_v22 = vrot.slane %v1314_v33, %v1667_v56 }
 0x379   :  { %v768_v21 = vrot.slane %v1316_v61, %v1667_v56  ;;  %v772_v37 = vrot.slane %v1316_v61, %v1636_v24  ;;  %v776_v56 = vrot.slane %v1316_v61, %v1643_v31  ;;  %v780_v24 = vrot.slane %v1316_v61, %v1653_v38 }
 0x37a   :  { %v834_v32 = vmul.f32 %v1679_v63, %v760_v35  ;;  %v833_v41 = vmul.f32 %v1675_v30, %v756_v26  ;;  %v843_v63 = vmul.f32 %v1715_v51, %v796_v55  ;;  %v835_v30 = vmul.f32 %v1706_v49, %v764_v57 }
 0x37b   :  { %v844_v59 = vmul.f32 %v1723_v58, %v800_v22  ;;  %v836_v40 = vmul.f32 %v1720_v53, %v768_v21  ;;  %v845_v51 = vmul.f32 %v1683_v62, %v804_v20  ;;  %v837_v49 = vmul.f32 %v1726_v39, %v772_v37 }
 0x37c   :  { %856 = vperm.xlu1 %1280, %v834_v32   ;;  %851 = vperm.xlu0 %1279, %v833_v41   ;;  %v846_v58 = vmul.f32 %v1692_v60, %v808_v50  ;;  %v838_v53 = vmul.f32 %v1729_v1, %v776_v56  ;;  %v847_v62 = vmul.f32 %v1701_v44, %v812_v54 }
 0x37d   :  { %v839_v39 = vmul.f32 %v1732_v48, %v780_v24  ;;  %v784_v31 = vrot.slane %v1316_v61, %v1659_v47  ;;  %v848_v60 = vmul.f32 %v1710_v29, %v816_v2 }
 0x37f   :  { %v840_v1 = vmul.f32 %v1735_v27, %v784_v31 }
 0x380   :  { %896 = vperm.xlu0 %1279, %v842_v43   ;;  %891 = vperm.xlu1 %1280, %v841_v45  }
 0x384   :  { %901 = vperm.xlu0 %1279, %v843_v63   ;;  %861 = vperm.xlu1 %1280, %v835_v30  }
 0x388   :  { %906 = vperm.xlu0 %1279, %v844_v59   ;;  %866 = vperm.xlu1 %1280, %v836_v40  }
 0x38c   :  { %911 = vperm.xlu0 %1279, %v845_v51   ;;  %871 = vperm.xlu1 %1280, %v837_v49  }
 0x390   :  { %916 = vperm.xlu0 %1279, %v846_v58   ;;  %876 = vperm.xlu1 %1280, %v838_v53  }
 0x394   :  { %921 = vperm.xlu0 %1279, %v847_v62   ;;  %881 = vperm.xlu1 %1280, %v839_v39  }
 0x398   :  { %926 = vperm.xlu0 %1279, %v848_v60   ;;  %886 = vperm.xlu1 %1280, %v840_v1  }
 0x3f7   :  { %v857_v25 = vpop.permute.xlu1 %856  ;;  %v852_v38 = vpop.permute.xlu0 %851 }
 0x3f8   :  { %v930_v36 = vmul.f32 %v857_v25, %v1436_v6  ;;  %v929_v44 = vmul.f32 %v852_v38, %v1432_v4  ;;  %v1098_v45 = vrot.slane %v857_v25, %v1570_v0  ;;  %v1094_v57 = vrot.slane %v852_v38, %v1570_v0 }
 0x3fa   :  { %v952_v48 = vsel %vm75_vm0, %v930_v36, 0.0  ;;  %v945_v46 = vsel %vm75_vm0, %v929_v44, 0.0  ;;  %v1155_v56 = vsel %vm439_vm2, %v1098_v45, %v1094_v57 }
 0x3fb   :  { %v953_v19 = vrot.slane %v952_v48, 4  ;;  %v946_v47 = vrot.slane %v945_v46, 4  ;;  %v892_v52 = vpop.permute.xlu1 %891  ;;  %v897_v23 = vpop.permute.xlu0 %896 }
 0x3fc   :  { %v937_v29 = vmul.f32 %v892_v52, %v1434_v5  ;;  %v938_v27 = vmul.f32 %v897_v23, %v1438_v7  ;;  %v1130_v20 = vrot.slane %v897_v23, %v1570_v0 }
 0x3fd   :  { %v954_v3 = vadd.f32 %v953_v19, %v952_v48  ;;  %v947_v28 = vadd.f32 %v946_v47, %v945_v46 }
 0x3fe   :  { %v1001_v33 = vsel %vm75_vm0, %v937_v29, 0.0  ;;  %v1008_v6 = vsel %vm75_vm0, %v938_v27, 0.0 }
 0x3ff   :  { %v955_v61 = vrot.slane %v954_v3, 2  ;;  %v948_v4 = vrot.slane %v947_v28, 2  ;;  %v862_v35 = vpop.permute.xlu1 %861  ;;  %v902_v26 = vpop.permute.xlu0 %901  ;;  %v1002_v32 = vrot.slane %v1001_v33, 4  ;;  %v1009_v42 = vrot.slane %v1008_v6, 4 }
 0x400   :  { %v931_v41 = vmul.f32 %v862_v35, %v1440_v8  ;;  %v939_v34 = vmul.f32 %v902_v26, %v1442_v9  ;;  %v1126_v9 = vrot.slane %v892_v52, %v1570_v0  ;;  %v1102_v51 = vrot.slane %v862_v35, %v1570_v0 }
 0x401   :  { %v956_v43 = vadd.f32 %v955_v61, %v954_v3  ;;  %v949_v55 = vadd.f32 %v948_v4, %v947_v28  ;;  %v1003_v22 = vadd.f32 %v1002_v32, %v1001_v33  ;;  %v1010_v40 = vadd.f32 %v1009_v42, %v1008_v6 }
 0x402   :  { %v959_v5 = vsel %vm75_vm0, %v931_v41, 0.0  ;;  %v1015_v7 = vsel %vm75_vm0, %v939_v34, 0.0  ;;  %v1134_v60 = vrot.slane %v902_v26, %v1570_v0  ;;  %v1162_v38 = vsel %vm439_vm2, %v1130_v20, %v1126_v9 }
 0x403   :  { %v867_v63 = vpop.permute.xlu1 %866  ;;  %v1816_v30 = vpop.permute.xlu0 %906  ;;  %v960_v21 = vrot.slane %v959_v5, 4  ;;  %v1016_v59 = vrot.slane %v1015_v7, 4  ;;  %v957_v50 = vrot.slane %v956_v43, 1  ;;  %v950_v24 = vrot.slane %v949_v55, 1 }
 0x404   :  { %v932_v8 = vmul.f32 %v867_v63, %v1454_v10  ;;  %v1004_v62 = vrot.slane %v1003_v22, 2  ;;  %v940_v10 = vmul.f32 %v1816_v30, %v1458_v11  ;;  %v1011_v31 = vrot.slane %v1010_v40, 2 }
 0x405   :  { %v961_v37 = vadd.f32 %v960_v21, %v959_v5  ;;  %v1017_v58 = vadd.f32 %v1016_v59, %v1015_v7  ;;  %v1156_v36 = vsel %vm441_vm3, %v1102_v51, %v1155_v56  ;;  %v1106_v44 = vrot.slane %v867_v63, %v1570_v0 }
 0x406   :  { %v966_v49 = vsel %vm75_vm0, %v932_v8, 0.0  ;;  %v1022_v48 = vsel %vm75_vm0, %v940_v10, 0.0  ;;  %v958_v23 = vadd.f32 %v957_v50, %v956_v43  ;;  %v951_v29 = vadd.f32 %v950_v24, %v949_v55 }
 0x407   :  { %v967_v53 = vrot.slane %v966_v49, 4  ;;  %v872_v54 = vpop.permute.xlu1 %871  ;;  %v962_v39 = vrot.slane %v961_v37, 2  ;;  %v912_v2 = vpop.permute.xlu0 %911  ;;  %v1018_v19 = vrot.slane %v1017_v58, 2  ;;  %v1023_v47 = vrot.slane %v1022_v48, 4 }
 0x408   :  { %v933_v25 = vmul.f32 %v872_v54, %v1460_v12  ;;  %v1833_v27 = vadd.f32 %v1004_v62, %v1003_v22  ;;  %v1835_v12 = vadd.f32 %v1011_v31, %v1010_v40  ;;  %v1163_v28 = vsel %vm441_vm3, %v1134_v60, %v1162_v38 }
 0x409   :  { %v968_v1 = vadd.f32 %v967_v53, %v966_v49  ;;  %v963_v46 = vadd.f32 %v962_v39, %v961_v37  ;;  %v941_v6 = vmul.f32 %v912_v2, %v1462_v13  ;;  %v1157_v61 = vsel %vm443_vm4, %v1106_v44, %v1156_v36 }
 0x40a   :  { %v973_v11 = vsel %vm75_vm0, %v933_v25, 0.0  ;;  %v1024_v4 = vadd.f32 %v1023_v47, %v1022_v48  ;;  %v1138_v35 = vrot.slane %v1816_v30, %v1570_v0  ;;  %v1842_v34 = vadd.f32 %v1018_v19, %v1017_v58 }
 0x40b   :  { %v877_v52 = vpop.permute.xlu1 %876  ;;  %v974_v3 = vrot.slane %v973_v11, 4  ;;  %v969_v33 = vrot.slane %v968_v1, 2  ;;  %v917_v32 = vpop.permute.xlu0 %916  ;;  %v964_v41 = vrot.slane %v963_v46, 1  ;;  %v1110_v42 = vrot.slane %v872_v54, %v1570_v0 }
 0x40c   :  { %v1029_v5 = vsel %vm75_vm0, %v941_v6, 0.0  ;;  %v1847_v7 = vsel %vm439_vm2, %v958_v23, %v951_v29  ;;  %v1006_v13 = vrot.slane %v1833_v27, 1  ;;  %v1013_v57 = vrot.slane %v1835_v12, 1 }
 0x40d   :  { %v975_v26 = vadd.f32 %v974_v3, %v973_v11  ;;  %v1030_v45 = vrot.slane %v1029_v5, 4  ;;  %v970_v63 = vadd.f32 %v969_v33, %v968_v1  ;;  %v1142_v30 = vrot.slane %v912_v2, %v1570_v0 }
 0x40e   :  { %v934_v22 = vmul.f32 %v877_v52, %v1470_v14  ;;  %v1025_v21 = vrot.slane %v1024_v4, 2  ;;  %v1164_v59 = vsel %vm443_vm4, %v1138_v35, %v1163_v28  ;;  %v942_v9 = vmul.f32 %v917_v32, %v1474_v15 }
 0x40f   :  { %v976_v43 = vrot.slane %v975_v26, 2  ;;  %v882_v55 = vpop.permute.xlu1 %881  ;;  %v1031_v8 = vadd.f32 %v1030_v45, %v1029_v5  ;;  %v1855_v40 = vadd.f32 %v964_v41, %v963_v46  ;;  %v1020_v20 = vrot.slane %v1842_v34, 1  ;;  %v922_v58 = vpop.permute.xlu0 %921 }
 0x410   :  { %v1158_v37 = vsel %vm445_vm5, %v1110_v42, %v1157_v61  ;;  %v980_v51 = vsel %vm75_vm0, %v934_v22, 0.0  ;;  %v1114_v56 = vrot.slane %v877_v52, %v1570_v0  ;;  %v1036_v14 = vsel %vm75_vm0, %v942_v9, 0.0  ;;  %v1317_v42 = vld [vmem:[#allocation2 + $0x78] sm:$0xff] }
 0x411   :  { %v977_v49 = vadd.f32 %v976_v43, %v975_v26  ;;  %v981_v50 = vrot.slane %v980_v51, 4  ;;  %v971_v53 = vrot.slane %v970_v63, 1  ;;  %v1165_v54 = vsel %vm445_vm5, %v1142_v30, %v1164_v59 }
 0x412   :  { %v1037_v24 = vrot.slane %v1036_v14, 4  ;;  %v935_v15 = vmul.f32 %v882_v55, %v1476_v16  ;;  %v1864_v62 = vadd.f32 %v1025_v21, %v1024_v4  ;;  %v1032_v39 = vrot.slane %v1031_v8, 2 }
 0x413   :  { %v982_v10 = vadd.f32 %v981_v50, %v980_v51  ;;  %v1146_v2 = vrot.slane %v917_v32, %v1570_v0  ;;  %v887_v31 = vpop.permute.xlu1 %886  ;;  %v1118_v25 = vrot.slane %v882_v55, %v1570_v0  ;;  %v943_v38 = vmul.f32 %v922_v58, %v1478_v17  ;;  %v927_v28 = vpop.permute.xlu0 %926 }
 0x414   :  { %v1038_v60 = vadd.f32 %v1037_v24, %v1036_v14  ;;  %v987_v1 = vsel %vm75_vm0, %v935_v15, 0.0  ;;  %v978_v36 = vrot.slane %v977_v49, 1  ;;  %v1159_v48 = vsel %vm447_vm6, %v1114_v56, %v1158_v37 }
 0x415   :  { %v983_v44 = vrot.slane %v982_v10, 2  ;;  %v988_v46 = vrot.slane %v987_v1, 4  ;;  %v1043_v19 = vsel %vm75_vm0, %v943_v38, 0.0  ;;  %v1150_v47 = vrot.slane %v922_v58, %v1570_v0 }
 0x416   :  { %v1039_v16 = vrot.slane %v1038_v60, 2  ;;  %v936_v11 = vmul.f32 %v887_v31, %v1486_v18  ;;  %v1166_v23 = vsel %vm447_vm6, %v1146_v2, %v1165_v54  ;;  %v1044_v3 = vrot.slane %v1043_v19, 4 }
 0x417   :  { %v984_v52 = vadd.f32 %v983_v44, %v982_v10  ;;  %v989_v29 = vadd.f32 %v988_v46, %v987_v1  ;;  %v1033_v33 = vadd.f32 %v1032_v39, %v1031_v8  ;;  %v1160_v17 = vsel %vm449_vm7, %v1118_v25, %v1159_v48 }
 0x418   :  { %v994_v6 = vsel %vm75_vm0, %v936_v11, 0.0  ;;  %v1122_v61 = vrot.slane %v887_v31, %v1570_v0  ;;  %v1040_v4 = vadd.f32 %v1039_v16, %v1038_v60  ;;  %v1045_v26 = vadd.f32 %v1044_v3, %v1043_v19 }
 0x419   :  { %v990_v35 = vrot.slane %v989_v29, 2  ;;  %v995_v32 = vrot.slane %v994_v6, 4  ;;  %v1167_v41 = vsel %vm449_vm7, %v1150_v47, %v1166_v23  ;;  %v944_v5 = vmul.f32 %v1317_v42, %v927_v28 }
 0x41a   :  { %v1161_v18 = vsel %vm451_vm8, %v1122_v61, %v1160_v17  ;;  %v1154_v43 = vrot.slane %v927_v28, %v1570_v0  ;;  %v985_v45 = vrot.slane %v984_v52, 1  ;;  %v1046_v30 = vrot.slane %v1045_v26, 2 }
 0x41b   :  { %v991_v55 = vadd.f32 %v990_v35, %v989_v29  ;;  %v996_v22 = vadd.f32 %v995_v32, %v994_v6  ;;  %1171 = vst.msk [vmem:[%s1930_s5] sm:$0xff] %vm462_vm9, %v1161_v18  ;;  %v972_v21 = vadd.f32 %v971_v53, %v970_v63  ;;  %v1027_v59 = vrot.slane %v1864_v62, 1 }
 0x41c   :  { %v1050_v8 = vsel %vm75_vm0, %v944_v5, 0.0  ;;  %v1168_v9 = vsel %vm451_vm8, %v1154_v43, %v1167_v41  ;;  %v1047_v51 = vadd.f32 %v1046_v30, %v1045_v26  ;;  %v1007_v56 = vadd.f32 %v1006_v13, %v1833_v27 }
 0x41d   :  { %v992_v37 = vrot.slane %v991_v55, 1  ;;  %v997_v50 = vrot.slane %v996_v22, 2  ;;  %v1051_v0 = vrot.slane %v1050_v8, 4  ;;  %1172 = vst.msk [vmem:[%s1930_s5 + $0x8] sm:$0xff] %vm462_vm9, %v1168_v9  ;;  %v1014_v63 = vadd.f32 %v1013_v57, %v1835_v12  ;;  %s1389_s5 = smov [#allocation7]  }
 0x41e   :  { %v979_v14 = vadd.f32 %v978_v36, %v977_v49  ;;  %v1034_v58 = vrot.slane %v1033_v33, 1  ;;  %v986_v53 = vadd.f32 %v985_v45, %v984_v52  ;;  %v1041_v54 = vrot.slane %v1040_v4, 1  ;;  %s1178_s9 = sshll.u32 %s1389_s5, 4  ;;  %s1179_s9 = int_to_ptr.vmem [resolvable:$true] %s1178_s9 }
 0x41f   :  { %v998_v24 = vadd.f32 %v997_v50, %v996_v22  ;;  %v1052_v15 = vadd.f32 %v1051_v0, %v1050_v8  ;;  %v1074_v39 = vsel %vm441_vm3, %v1855_v40, %v1847_v7  ;;  %v1021_v10 = vadd.f32 %v1020_v20, %v1842_v34  ;;  %s1358_s10 = scalar_lea.vmem %s1179_s9, 256  ;;  %p1363_p11 = scmp.lt.s32.totalorder %s1179_s9, %s1179_s9 }
 0x420   :  { %v993_v2 = vadd.f32 %v992_v37, %v991_v55  ;;  %v1048_v27 = vrot.slane %v1047_v51, 1  ;;  %v1075_v13 = vsel %vm443_vm4, %v972_v21, %v1074_v39  ;;  %v1028_v12 = vadd.f32 %v1027_v59, %v1864_v62  ;;  %p1359_p10 = scmp.ne.s32.totalorder %s1179_s9, %s1358_s10  ;;  %p1364_p12 = scmp.lt.s32.totalorder %s1358_s10, %s1358_s10 }
 0x421   :  { %v999_v57 = vrot.slane %v998_v24, 1  ;;  %v1053_v49 = vrot.slane %v1052_v15, 2  ;;  %v1080_v31 = vsel %vm439_vm2, %v1014_v63, %v1007_v56  ;;  %v1035_v60 = vadd.f32 %v1034_v58, %v1033_v33 }
 0x422   :  { %v1076_v1 = vsel %vm445_vm5, %v979_v14, %v1075_v13  ;;  %v1042_v25 = vadd.f32 %v1041_v54, %v1040_v4  ;;  %v1081_v34 = vsel %vm441_vm3, %v1021_v10, %v1080_v31  ;;  %v1049_v20 = vadd.f32 %v1048_v27, %v1047_v51  ;;  %p1365_p13 = por %p1364_p12, %p1363_p11 }
 0x423   :  { %v1000_v38 = vadd.f32 %v999_v57, %v998_v24  ;;  %v1054_v7 = vadd.f32 %v1053_v49, %v1052_v15  ;;  %v1077_v40 = vsel %vm447_vm6, %v986_v53, %v1076_v1  ;;  %v1082_v44 = vsel %vm443_vm4, %v1028_v12, %v1081_v34 }
 0x424   :  { %v1078_v36 = vsel %vm449_vm7, %v993_v2, %v1077_v40  ;;  %v1083_v46 = vsel %vm445_vm5, %v1035_v60, %v1082_v44  ;;  %p1366_p0 = pnand %p1365_p13, %p1359_p10 }
 0x425   :  { %v1055_v62 = vrot.slane %v1054_v7, 1  ;;  %v1079_v48 = vsel %vm451_vm8, %v1000_v38, %v1078_v36  ;;  %v1084_v19 = vsel %vm447_vm6, %v1042_v25, %v1083_v46 }
 0x426   :  { %1089 = vst.msk [vmem:[#allocation7] sm:$0xff] %vm75_vm0, %v1079_v48  ;;  %v1085_v47 = vsel %vm449_vm7, %v1049_v20, %v1084_v19 }
 0x427   :  { %v1056_v16 = vadd.f32 %v1055_v62, %v1054_v7 }
 0x429   :  { %v1086_v11 = vsel %vm451_vm8, %v1056_v16, %v1085_v47 }
 0x42a   :  { %1090 = vst.msk [vmem:[#allocation7 + $0x8] sm:$0xff] %vm75_vm0, %v1086_v11 }
 0x42b   :  { %1369 = shalt.err (!%p1366_p0)
}
 0x42c   :  { %1184 = dma.vmem_to_hbm [thread:$0]  %s1179_s9, 256, %s1929_s4, [#allocation4], %s1385_s21, %s1385_s21, %s1386_s22  }
 0x42d   :  { %1382 = dma.done.wait [#allocation4], 256  }
 0x42e   :  { %1383 = vsyncadd [#allocation4], 4294967040 }
 0x42f   :  { %1192 = vsyncpa [#allocation3], 1 }
 0x430   :  { %1193 = vsyncpa [#allocation6], 1 }
 0x431   :  { %1194 = vsyncpa [#allocation4], 1 }

</bundles_post_ra>
